<compile_context>
chip_gen: v7x
topology: tpu7x:2x2x1
jax: 0.10.0
libtpu: 0.0.40
codegen_flags: <defaults>
</compile_context>

<pallas_src>
import jax
import jax.numpy as jnp
from jax.experimental import pallas as pl
from jax.experimental.pallas import tpu as pltpu

H1, H2 = 400, 300      # logical hidden sizes (torch module)
H1P, H2P = 512, 384    # lane-padded hidden sizes (multiples of 128)


def _round_up(n, m):
    return (n + m - 1) // m * m


def _critic_kernel(x_ref, u_ref, w1_ref, b1_ref, w2a_ref, w2b_ref, b2_ref,
                   w3_ref, b3_ref, o_ref):
    # Layer 1: relu(x @ W1 + b1) -- bf16 MXU, f32 accumulate, f32 bias/ReLU.
    h1 = jnp.dot(x_ref[...], w1_ref[...], preferred_element_type=jnp.float32)
    h1 = jnp.maximum(h1 + b1_ref[...], 0.0)

    # Layer 2: relu(cat([h1, u]) @ W2 + b2) == relu(h1 @ W2a + u @ W2b + b2).
    h2 = jnp.dot(h1.astype(jnp.bfloat16), w2a_ref[...],
                 preferred_element_type=jnp.float32)
    h2 = h2 + jnp.dot(u_ref[...], w2b_ref[...],
                      preferred_element_type=jnp.float32)
    h2 = jnp.maximum(h2 + b2_ref[...], 0.0)

    # Layer 3 (out_features == 1): VPU multiply + cross-lane reduce instead of
    # an N=1 MXU pass -- keeps the third serialized matmul off the MXU path.
    w3_row = w3_ref[...].astype(jnp.float32)            # (1, H2P)
    q = jnp.sum(h2 * w3_row, axis=-1, keepdims=True)    # (TB, 1)
    o_ref[...] = q + b3_ref[...]


def critic_dense_forward(x, u, params, *, block_b=256):
    """x: (B, state_dim) f32, u: (B, action_dim) f32 -> (B, 1) f32."""
    w1, b1, w2a, w2b, b2, w3, b3 = params
    B, state_dim = x.shape
    action_dim = u.shape[1]

    # Batch tile: multiple of 8 sublanes, capped at block_b.
    tb = min(_round_up(block_b, 8), _round_up(B, 8))
    b_pad = _round_up(B, tb)
    if b_pad != B:
        x = jnp.pad(x, ((0, b_pad - B), (0, 0)))
        u = jnp.pad(u, ((0, b_pad - B), (0, 0)))

    # bf16 activations/weights on the wire; f32 accumulation in-kernel.
    xb = x.astype(jnp.bfloat16)
    ub = u.astype(jnp.bfloat16)

    grid = (b_pad // tb,)

    def resident(shape):
        # Same block index every grid step -> stays in VMEM, no re-DMA.
        return pl.BlockSpec(shape, lambda i: tuple(0 for _ in shape))

    out = pl.pallas_call(
        _critic_kernel,
        out_shape=jax.ShapeDtypeStruct((b_pad, 1), jnp.float32),
        grid=grid,
        in_specs=[
            pl.BlockSpec((tb, state_dim), lambda i: (i, 0)),   # x tile
            pl.BlockSpec((tb, action_dim), lambda i: (i, 0)),  # u tile
            resident(w1.shape),
            resident(b1.shape),
            resident(w2a.shape),
            resident(w2b.shape),
            resident(b2.shape),
            resident(w3.shape),
            resident(b3.shape),
        ],
        out_specs=pl.BlockSpec((tb, 1), lambda i: (i, 0)),
        compiler_params=pltpu.CompilerParams(
            dimension_semantics=("parallel",)),  # megacore split on v7x
    )(xb, ub, w1, b1, w2a, w2b, b2, w3, b3)
    return out[:B]


def init_params(key, state_dim, action_dim):
    """Torch-style U(-1/sqrt(fan_in), ...) init, then pad + cast for the kernel."""
    ks = jax.random.split(key, 6)

    def lin(kw, kb, fan_in, fan_out):
        bound = 1.0 / jnp.sqrt(fan_in)
        w = jax.random.uniform(kw, (fan_in, fan_out), jnp.float32, -bound, bound)
        b = jax.random.uniform(kb, (1, fan_out), jnp.float32, -bound, bound)
        return w, b

    w1, b1 = lin(ks[0], ks[1], state_dim, H1)
    w2, b2 = lin(ks[2], ks[3], H1 + action_dim, H2)
    w3, b3 = lin(ks[4], ks[5], H2, 1)

    # Split W2 to reproduce cat([h1, u], dim=1) @ W2 == h1 @ W2a + u @ W2b.
    w2a = w2[:H1, :]            # (400, 300)
    w2b = w2[H1:, :]            # (action_dim, 300)

    # Zero-pad hidden dims 400->512 / 300->384: padded h1/h2 columns stay
    # exactly 0 through bias+ReLU, so outputs are unchanged but tiles are
    # lane-dense (no masked vregs on the MXU outputs).
    w1p = jnp.pad(w1, ((0, 0), (0, H1P - H1)))
    b1p = jnp.pad(b1, ((0, 0), (0, H1P - H1)))
    w2ap = jnp.pad(w2a, ((0, H1P - H1), (0, H2P - H2)))
    w2bp = jnp.pad(w2b, ((0, 0), (0, H2P - H2)))
    b2p = jnp.pad(b2, ((0, 0), (0, H2P - H2)))
    w3p = jnp.pad(w3.T, ((0, 0), (0, H2P - H2)))   # (1, 384) row vector

    # bf16 weights (halve HBM->VMEM DMA bytes), f32 biases.
    return (w1p.astype(jnp.bfloat16), b1p,
            w2ap.astype(jnp.bfloat16), w2bp.astype(jnp.bfloat16), b2p,
            w3p.astype(jnp.bfloat16), b3)


def reference_forward(x, u, params):
    """Pure-JAX reference with the same bf16-in / f32-accumulate math."""
    w1, b1, w2a, w2b, b2, w3, b3 = params
    xb = x.astype(jnp.bfloat16)
    ub = u.astype(jnp.bfloat16)
    h1 = jnp.maximum(
        jnp.dot(xb, w1, preferred_element_type=jnp.float32) + b1, 0.0)
    h2 = (jnp.dot(h1.astype(jnp.bfloat16), w2a,
                  preferred_element_type=jnp.float32)
          + jnp.dot(ub, w2b, preferred_element_type=jnp.float32))
    h2 = jnp.maximum(h2 + b2, 0.0)
    return jnp.sum(h2 * w3.astype(jnp.float32), axis=-1, keepdims=True) + b3


if __name__ == "__main__":
    B, STATE_DIM, ACTION_DIM = 8, 16, 4

    key = jax.random.PRNGKey(0)
    k_x, k_u, k_p = jax.random.split(key, 3)

    x = jax.random.normal(k_x, (B, STATE_DIM), jnp.float32)
    u = jax.random.normal(k_u, (B, ACTION_DIM), jnp.float32)
    params = init_params(k_p, STATE_DIM, ACTION_DIM)

    out = jax.block_until_ready(critic_dense_forward(x, u, params))
    ref = reference_forward(x, u, params)

    assert out.shape == (B, 1)
    assert jnp.allclose(out, ref, atol=2e-3, rtol=2e-3)

    print("KERNEL_OK")
</pallas_src>

<mosaic_0001>
module attributes {stable_mosaic.version = 11 : i64} {
  func.func @_critic_kernel(%arg0: i32, %arg1: memref<8x16xbf16, #tpu.memory_space<vmem>>, %arg2: memref<8x4xbf16, #tpu.memory_space<vmem>>, %arg3: memref<16x512xbf16, #tpu.memory_space<vmem>>, %arg4: memref<1x512xf32, #tpu.memory_space<vmem>>, %arg5: memref<512x384xbf16, #tpu.memory_space<vmem>>, %arg6: memref<4x384xbf16, #tpu.memory_space<vmem>>, %arg7: memref<1x384xf32, #tpu.memory_space<vmem>>, %arg8: memref<1x384xbf16, #tpu.memory_space<vmem>>, %arg9: memref<1x1xf32, #tpu.memory_space<vmem>>, %arg10: memref<8x1xf32, #tpu.memory_space<vmem>>) attributes {dimension_semantics = [#tpu.dimension_semantics<parallel>], iteration_bounds = array<i64: 1>, scalar_prefetch = 0 : i64, scratch_operands = 0 : i64, tpu.core_type = #tpu.core_type<tc>, window_params = [{transform_indices = @transform_0, window_bounds = array<i64: 8, 16>}, {transform_indices = @transform_1, window_bounds = array<i64: 8, 4>}, {pipeline_mode = #tpu.pipeline_mode<synchronous>, transform_indices = @transform_2, window_bounds = array<i64: 16, 512>}, {pipeline_mode = #tpu.pipeline_mode<synchronous>, transform_indices = @transform_3, window_bounds = array<i64: 1, 512>}, {pipeline_mode = #tpu.pipeline_mode<synchronous>, transform_indices = @transform_4, window_bounds = array<i64: 512, 384>}, {pipeline_mode = #tpu.pipeline_mode<synchronous>, transform_indices = @transform_5, window_bounds = array<i64: 4, 384>}, {pipeline_mode = #tpu.pipeline_mode<synchronous>, transform_indices = @transform_6, window_bounds = array<i64: 1, 384>}, {pipeline_mode = #tpu.pipeline_mode<synchronous>, transform_indices = @transform_7, window_bounds = array<i64: 1, 384>}, {pipeline_mode = #tpu.pipeline_mode<synchronous>, transform_indices = @transform_8, window_bounds = array<i64: 1, 1>}, {transform_indices = @transform_9, window_bounds = array<i64: 8, 1>}]} {
    %c0 = arith.constant 0 : index
    %c0_0 = arith.constant 0 : index
    %0 = vector.load %arg1[%c0, %c0_0] : memref<8x16xbf16, #tpu.memory_space<vmem>>, vector<8x16xbf16>
    %c0_1 = arith.constant 0 : index
    %c0_2 = arith.constant 0 : index
    %1 = vector.load %arg3[%c0_1, %c0_2] : memref<16x512xbf16, #tpu.memory_space<vmem>>, vector<16x512xbf16>
    %cst = arith.constant dense<0.000000e+00> : vector<8x512xf32>
    %2 = tpu.matmul %0, %1, %cst {dimension_numbers = #tpu.dot_dimension_numbers<[1], [0], [0], [1], [0, 0, 1, 1], [], []>} : vector<8x16xbf16>, vector<16x512xbf16>, vector<8x512xf32> -> vector<8x512xf32>
    %c0_3 = arith.constant 0 : index
    %c0_4 = arith.constant 0 : index
    %3 = vector.load %arg4[%c0_3, %c0_4] : memref<1x512xf32, #tpu.memory_space<vmem>>, vector<1x512xf32>
    %4 = vector.broadcast %3 : vector<1x512xf32> to vector<8x512xf32>
    %5 = arith.addf %2, %4 : vector<8x512xf32>
    %cst_5 = arith.constant 0.000000e+00 : f32
    %6 = vector.broadcast %cst_5 : f32 to vector<8x512xf32>
    %7 = arith.maximumf %5, %6 : vector<8x512xf32>
    %8 = arith.truncf %7 : vector<8x512xf32> to vector<8x512xbf16>
    %c0_6 = arith.constant 0 : index
    %c0_7 = arith.constant 0 : index
    %9 = vector.load %arg5[%c0_6, %c0_7] : memref<512x384xbf16, #tpu.memory_space<vmem>>, vector<512x384xbf16>
    %cst_8 = arith.constant dense<0.000000e+00> : vector<8x384xf32>
    %10 = tpu.matmul %8, %9, %cst_8 {dimension_numbers = #tpu.dot_dimension_numbers<[1], [0], [0], [1], [0, 0, 1, 1], [], []>} : vector<8x512xbf16>, vector<512x384xbf16>, vector<8x384xf32> -> vector<8x384xf32>
    %c0_9 = arith.constant 0 : index
    %c0_10 = arith.constant 0 : index
    %11 = vector.load %arg2[%c0_9, %c0_10] : memref<8x4xbf16, #tpu.memory_space<vmem>>, vector<8x4xbf16>
    %c0_11 = arith.constant 0 : index
    %c0_12 = arith.constant 0 : index
    %12 = vector.load %arg6[%c0_11, %c0_12] : memref<4x384xbf16, #tpu.memory_space<vmem>>, vector<4x384xbf16>
    %cst_13 = arith.constant dense<0.000000e+00> : vector<8x384xf32>
    %13 = tpu.matmul %11, %12, %cst_13 {dimension_numbers = #tpu.dot_dimension_numbers<[1], [0], [0], [1], [0, 0, 1, 1], [], []>} : vector<8x4xbf16>, vector<4x384xbf16>, vector<8x384xf32> -> vector<8x384xf32>
    %14 = arith.addf %10, %13 : vector<8x384xf32>
    %c0_14 = arith.constant 0 : index
    %c0_15 = arith.constant 0 : index
    %15 = vector.load %arg7[%c0_14, %c0_15] : memref<1x384xf32, #tpu.memory_space<vmem>>, vector<1x384xf32>
    %16 = vector.broadcast %15 : vector<1x384xf32> to vector<8x384xf32>
    %17 = arith.addf %14, %16 : vector<8x384xf32>
    %cst_16 = arith.constant 0.000000e+00 : f32
    %18 = vector.broadcast %cst_16 : f32 to vector<8x384xf32>
    %19 = arith.maximumf %17, %18 : vector<8x384xf32>
    %c0_17 = arith.constant 0 : index
    %c0_18 = arith.constant 0 : index
    %20 = vector.load %arg8[%c0_17, %c0_18] : memref<1x384xbf16, #tpu.memory_space<vmem>>, vector<1x384xbf16>
    %21 = arith.extf %20 : vector<1x384xbf16> to vector<1x384xf32>
    %22 = vector.broadcast %21 : vector<1x384xf32> to vector<8x384xf32>
    %23 = arith.mulf %19, %22 : vector<8x384xf32>
    %cst_19 = arith.constant dense<0.000000e+00> : vector<8xf32>
    %24 = vector.multi_reduction <add>, %23, %cst_19 [1] : vector<8x384xf32> to vector<8xf32>
    %25 = vector.shape_cast %24 : vector<8xf32> to vector<8x1xf32>
    %c0_20 = arith.constant 0 : index
    %c0_21 = arith.constant 0 : index
    %26 = vector.load %arg9[%c0_20, %c0_21] : memref<1x1xf32, #tpu.memory_space<vmem>>, vector<1x1xf32>
    %27 = vector.broadcast %26 : vector<1x1xf32> to vector<8x1xf32>
    %28 = arith.addf %25, %27 : vector<8x1xf32>
    %c0_22 = arith.constant 0 : index
    %c0_23 = arith.constant 0 : index
    %29 = vector.load %arg10[%c0_22, %c0_23] : memref<8x1xf32, #tpu.memory_space<vmem>>, vector<8x1xf32>
    tpu.vector_store %arg10[%c0_22, %c0_23], %28 {strides = array<i32>} : memref<8x1xf32, #tpu.memory_space<vmem>>, vector<8x1xf32>,
    return
  }
  func.func @transform_0(%arg0: i32) -> (i32, i32) {
    %c0_i32 = arith.constant 0 : i32
    %c0_i32_0 = arith.constant 0 : i32
    return %arg0, %c0_i32 : i32, i32
  }
  func.func @transform_1(%arg0: i32) -> (i32, i32) {
    %c0_i32 = arith.constant 0 : i32
    %c0_i32_0 = arith.constant 0 : i32
    return %arg0, %c0_i32 : i32, i32
  }
  func.func @transform_2(%arg0: i32) -> (i32, i32) {
    %c0_i32 = arith.constant 0 : i32
    %c0_i32_0 = arith.constant 0 : i32
    %c0_i32_1 = arith.constant 0 : i32
    return %c0_i32, %c0_i32_0 : i32, i32
  }
  func.func @transform_3(%arg0: i32) -> (i32, i32) {
    %c0_i32 = arith.constant 0 : i32
    %c0_i32_0 = arith.constant 0 : i32
    %c0_i32_1 = arith.constant 0 : i32
    return %c0_i32, %c0_i32_0 : i32, i32
  }
  func.func @transform_4(%arg0: i32) -> (i32, i32) {
    %c0_i32 = arith.constant 0 : i32
    %c0_i32_0 = arith.constant 0 : i32
    %c0_i32_1 = arith.constant 0 : i32
    return %c0_i32, %c0_i32_0 : i32, i32
  }
  func.func @transform_5(%arg0: i32) -> (i32, i32) {
    %c0_i32 = arith.constant 0 : i32
    %c0_i32_0 = arith.constant 0 : i32
    %c0_i32_1 = arith.constant 0 : i32
    return %c0_i32, %c0_i32_0 : i32, i32
  }
  func.func @transform_6(%arg0: i32) -> (i32, i32) {
    %c0_i32 = arith.constant 0 : i32
    %c0_i32_0 = arith.constant 0 : i32
    %c0_i32_1 = arith.constant 0 : i32
    return %c0_i32, %c0_i32_0 : i32, i32
  }
  func.func @transform_7(%arg0: i32) -> (i32, i32) {
    %c0_i32 = arith.constant 0 : i32
    %c0_i32_0 = arith.constant 0 : i32
    %c0_i32_1 = arith.constant 0 : i32
    return %c0_i32, %c0_i32_0 : i32, i32
  }
  func.func @transform_8(%arg0: i32) -> (i32, i32) {
    %c0_i32 = arith.constant 0 : i32
    %c0_i32_0 = arith.constant 0 : i32
    %c0_i32_1 = arith.constant 0 : i32
    return %c0_i32, %c0_i32_0 : i32, i32
  }
  func.func @transform_9(%arg0: i32) -> (i32, i32) {
    %c0_i32 = arith.constant 0 : i32
    %c0_i32_0 = arith.constant 0 : i32
    return %arg0, %c0_i32 : i32, i32
  }
}

</mosaic_0001>

<bundles_post_ra>
// kernel: tpu_custom_call.1
= control target key start
LH: loop header
LB: loop body
LE: loop exit
PB: predicated region body
PF: predicated region fallthrough
CT: control target
= control target key end

     0   :  { %s1700_s0 = inlined_call_operand.vmem [shape: bf16[8,16], index: 0, kind: input, shape index: {}]   ;;  %s1701_s1 = inlined_call_operand.vmem [shape: bf16[8,4], index: 1, kind: input, shape index: {}]   ;;  %s1702_s2 = inlined_call_operand.hbm [shape: bf16[16,512], index: 2, kind: input, shape index: {}]   ;;  %s1703_s3 = inlined_call_operand.vmem [shape: f32[1,512], index: 3, kind: input, shape index: {}]   ;;  %s1704_s4 = inlined_call_operand.hbm [shape: bf16[512,384], index: 4, kind: input, shape index: {}]   ;;  %s1705_s5 = inlined_call_operand.vmem [shape: bf16[4,384], index: 5, kind: input, shape index: {}]   ;;  %s1706_s6 = inlined_call_operand.vmem [shape: f32[1,384], index: 6, kind: input, shape index: {}]   ;;  %s1707_s7 = inlined_call_operand.vmem [shape: bf16[1,384], index: 7, kind: input, shape index: {}]   ;;  %s1708_s8 = inlined_call_operand.<no memory space> [shape: f32[1,1], index: 8, kind: input, shape index: {}]   ;;  %s1709_s9 = inlined_call_operand.vmem [shape: f32[8,1], index: 9, kind: output, shape index: {}]  }
   0x1   :  { %v14_v0 = vstv %s1708_s8 }
   0x2   :  { %15 = vst [vmem:[#allocation2] sm:$0x1] %v14_v0 }
   0x3   :  { %16 = vsyncpa [#allocation4], 0 }
   0x4   :  { %17 = vsyncpa [#allocation6], 0  ;;  %s1547_s11 = smov [#allocation3]   ;;  %s1499_s15 = scalar_lea.hbm %s1702_s2, 512 }
   0x5   :  { %s27_s12 = sshll.u32 %s1547_s11, 4  ;;  %p1500_p0 = scmp.ne.s32.totalorder %s1702_s2, %s1499_s15  ;;  %s28_s12 = int_to_ptr.vmem [resolvable:$true] %s27_s12 }
   0x6   :  { %p1503_p1 = scmp.lt.u32.totalorder %s1499_s15, %s1702_s2 }
   0x8   :  { %p1505_p2 = pnand %p1503_p1, %p1500_p0 }
   0xa   :  { %1508 = shalt.err (!%p1505_p2)
}
   0xb   :  { %s1509_s8 = scalar_lea.vmem %s28_s12, 512  ;;  %p1514_p4 = scmp.lt.s32.totalorder %s28_s12, %s28_s12 }
   0xc   :  { %p1510_p3 = scmp.ne.s32.totalorder %s28_s12, %s1509_s8  ;;  %p1515_p5 = scmp.lt.s32.totalorder %s1509_s8, %s1509_s8 }
   0xe   :  { %p1516_p6 = por %p1515_p5, %p1514_p4 }
  0x10   :  { %p1517_p7 = pnand %p1516_p6, %p1510_p3 }
  0x12   :  { %1520 = shalt.err (!%p1517_p7)
}
  0x13   :  { %s1548_s20 = smov 256   ;;  %s1549_s21 = smov 16  }
  0x14   :  { %33 = dma.hbm_to_vmem [thread:$0]  %s1702_s2, 512, %s28_s12, [#allocation4], %s1548_s20, %s1548_s20, %s1549_s21  }
  0x15   :  { %s1550_s24 = smov [#allocation5]   ;;  %s1521_s28 = scalar_lea.hbm %s1704_s4, 12288 }
  0x16   :  { %s41_s25 = sshll.u32 %s1550_s24, 4  ;;  %p1522_p8 = scmp.ne.s32.totalorder %s1704_s4, %s1521_s28  ;;  %s42_s25 = int_to_ptr.vmem [resolvable:$true] %s41_s25 }
  0x17   :  { %p1525_p9 = scmp.lt.u32.totalorder %s1521_s28, %s1704_s4 }
  0x19   :  { %p1527_p10 = pnand %p1525_p9, %p1522_p8 }
  0x1b   :  { %1530 = shalt.err (!%p1527_p10)
}
  0x1c   :  { %s1531_s13 = scalar_lea.vmem %s42_s25, 12288  ;;  %p1536_p12 = scmp.lt.s32.totalorder %s42_s25, %s42_s25 }
  0x1d   :  { %p1532_p11 = scmp.ne.s32.totalorder %s42_s25, %s1531_s13  ;;  %p1537_p13 = scmp.lt.s32.totalorder %s1531_s13, %s1531_s13 }
  0x1f   :  { %p1538_p0 = por %p1537_p13, %p1536_p12 }
  0x21   :  { %p1539_p1 = pnand %p1538_p0, %p1532_p11 }
  0x23   :  { %1542 = shalt.err (!%p1539_p1)
}
  0x24   :  { %s1551_s2 = smov 192   ;;  %s1552_s12 = smov 12  }
  0x25   :  { %47 = dma.hbm_to_vmem [thread:$0]  %s1704_s4, 12288, %s42_s25, [#allocation6], %s1551_s2, %s1551_s2, %s1552_s12  }
  0x26   :  { %1543 = dma.done.wait [#allocation4], 512  }
  0x27   :  { %1544 = vsyncadd [#allocation4], 4294966784 }
  0x28   :  { %1545 = dma.done.wait [#allocation6], 12288  }
  0x29   :  { %1546 = vsyncadd [#allocation6], 4294955008  ;;  %v70_v1 = vlaneseq  ;;  %v1553_v2 = vmov 0   ;;  %v1554_v3 = vmov 1983009808   ;;  %vm355_vm0 = vcmask 1041408  }
  0x2a   :  { %146 = vmatprep.mubr.bf16.mxu0 %v1553_v2  ;;  %187 = vmatprep.mubr.bf16.mxu1 %v1553_v2  ;;  %v337_v4 = vunpack.c.l.s4 %v1554_v3  ;;  %v1364_v7 = vld [vmem:[#allocation3 + $0x4] ss:$16 sps:$4 sm:$0xff]   ;;  %v1366_v9 = vld [vmem:[#allocation3 + $0xc] ss:$16 sps:$4 sm:$0xff]   ;;  %v1368_v10 = vld [vmem:[#allocation3] ss:$16 sps:$4 sm:$0xff]  }
  0x2b   :  { %v1634_v5 = vshrl.u32 %v70_v1, 7  ;;  %114 = vmatprep.subr.bf16.mxu0 %v1364_v7  ;;  %v1369_v11 = vld [vmem:[#allocation3 + $0x8] ss:$16 sps:$4 sm:$0xff]   ;;  %155 = vmatprep.subr.bf16.mxu1 %v1366_v9  ;;  %v333_v12 = vld [vmem:[%s1705_s5] sm:$0x3f]  ;;  %vm110_vm1 = vcmask 130048  }
  0x2c   :  { %v338_v6 = vunpack.c.0.s8 %v337_v4  ;;  %115 = vmatpush1.bf16.msra.mxu0 %v1368_v10  ;;  %156 = vmatpush1.bf16.msra.mxu1 %v1369_v11  ;;  %v63_v13 = vld [vmem:[%s1700_s0] sm:$0xf]  ;;  %v335_v15 = vcombine.high %v333_v12, %v333_v12  ;;  %v1555_v16 = vmov 0.0   ;;  %v1373_v20 = vld [vmem:[#allocation5 + $0x4] ss:$12 sps:$4 sm:$0xff]   ;;  %vm1556_vm2 = vmmov 0  }
  0x2d   :  { %1348 = vmatprep.subr.bf16.mxu1 %v1555_v16  ;;  %v1376_v21 = vld [vmem:[#allocation5 + $0x184] ss:$12 sps:$4 sm:$0xff]   ;;  %v332_v23 = vld [vmem:[%s1701_s1] sm:$0xf]  ;;  %vm351_vm3 = vcmask 31744   ;;  %vm1188_vm4 = vcmask 7168  }
  0x2e   :  { %v341_v8 = vsub.s32 %v338_v6, %v1634_v5  ;;  %v1371_v24 = vld [vmem:[#allocation5] ss:$12 sps:$4 sm:$0xff]   ;;  %v1379_v26 = vld [vmem:[#allocation5 + $0x1c] ss:$12 sps:$4 sm:$0xff]   ;;  %v1377_v28 = vld [vmem:[#allocation5 + $0x18] ss:$12 sps:$4 sm:$0xff]  }
  0x2f   :  { %1200 = vmatmul.mubr.msk.bf16.vlgmr.msra.gmra.mrb[0].mxu0 %vm110_vm1, %v63_v13  ;;  %1201 = vmatmul.mubr.msk.bf16.vlgmr.msra.gmra.mrb[0].mxu1 %vm110_vm1, %v63_v13  ;;  %v1374_v25 = vld [vmem:[#allocation5 + $0x180] ss:$12 sps:$4 sm:$0xff]   ;;  %v1382_v27 = vld [vmem:[#allocation5 + $0x19c] ss:$12 sps:$4 sm:$0xff]   ;;  %v1380_v29 = vld [vmem:[#allocation5 + $0x198] ss:$12 sps:$4 sm:$0xff]  }
  0x30   :  { %v342_v14 = vrot.slane %v333_v12, %v341_v8  ;;  %v349_v19 = vrot.slane %v335_v15, %v341_v8  ;;  %397 = vmatprep.mubr.bf16.mxu0 %v1553_v2  ;;  %1350 = vmatprep.mubr.msk.bf16.mxu1 %vm1556_vm2, %v1555_v16  ;;  %v1385_v30 = vld [vmem:[#allocation5 + $0x34] ss:$12 sps:$4 sm:$0xff]   ;;  %v1383_v32 = vld [vmem:[#allocation5 + $0x30] ss:$12 sps:$4 sm:$0xff]   ;;  %v1391_v34 = vld [vmem:[#allocation5 + $0x4c] ss:$12 sps:$4 sm:$0xff]  }
  0x31   :  { %v1388_v31 = vld [vmem:[#allocation5 + $0x1b4] ss:$12 sps:$4 sm:$0xff]   ;;  %v1386_v33 = vld [vmem:[#allocation5 + $0x1b0] ss:$12 sps:$4 sm:$0xff]   ;;  %v1394_v35 = vld [vmem:[#allocation5 + $0x1cc] ss:$12 sps:$4 sm:$0xff]  }
  0x32   :  { %v350_v17 = vcombine.high %v342_v14, %v342_v14  ;;  %v357_v18 = vsel %vm355_vm0, %v342_v14, 0  ;;  %v363_v22 = vsel %vm355_vm0, %v349_v19, 0  ;;  %v1389_v36 = vld [vmem:[#allocation5 + $0x48] ss:$12 sps:$4 sm:$0xff]   ;;  %v1397_v38 = vld [vmem:[#allocation5 + $0x64] ss:$12 sps:$4 sm:$0xff]  }
  0x33   :  { %1349 = vmatpush3.bf16.msra.mxu1 %v363_v22  ;;  %v1392_v37 = vld [vmem:[#allocation5 + $0x1c8] ss:$12 sps:$4 sm:$0xff]   ;;  %v1400_v39 = vld [vmem:[#allocation5 + $0x1e4] ss:$12 sps:$4 sm:$0xff]   ;;  %v1395_v40 = vld [vmem:[#allocation5 + $0x60] ss:$12 sps:$4 sm:$0xff]  }
  0x34   :  { %1202 = vmatprep.subr.msk.bf16.mxu0 %vm355_vm0, %v350_v17  ;;  %999 = vmatprep.subr.bf16.mxu1 %v1376_v21  ;;  %v1398_v41 = vld [vmem:[#allocation5 + $0x1e0] ss:$12 sps:$4 sm:$0xff]   ;;  %v1403_v42 = vld [vmem:[#allocation5 + $0x7c] ss:$12 sps:$4 sm:$0xff]   ;;  %v1401_v44 = vld [vmem:[#allocation5 + $0x78] ss:$12 sps:$4 sm:$0xff]  }
  0x35   :  { %366 = vmatpush1.bf16.msra.mxu0 %v357_v18  ;;  %v1406_v43 = vld [vmem:[#allocation5 + $0x1fc] ss:$12 sps:$4 sm:$0xff]   ;;  %v1404_v45 = vld [vmem:[#allocation5 + $0x1f8] ss:$12 sps:$4 sm:$0xff]   ;;  %v1409_v46 = vld [vmem:[#allocation5 + $0x94] ss:$12 sps:$4 sm:$0xff]  }
  0x36   :  { %958 = vmatprep.subr.bf16.mxu0 %v1373_v20  ;;  %v1412_v47 = vld [vmem:[#allocation5 + $0x214] ss:$12 sps:$4 sm:$0xff]   ;;  %v1407_v48 = vld [vmem:[#allocation5 + $0x90] ss:$12 sps:$4 sm:$0xff]   ;;  %v1415_v50 = vld [vmem:[#allocation5 + $0xac] ss:$12 sps:$4 sm:$0xff]  }
  0x37   :  { %1351 = vmatmul.mubr.msk.bf16.vlgmr.msra.gmra.mrb[4].mxu1 %vm351_vm3, %v332_v23  ;;  %v1410_v49 = vld [vmem:[#allocation5 + $0x210] ss:$12 sps:$4 sm:$0xff]   ;;  %v1418_v51 = vld [vmem:[#allocation5 + $0x22c] ss:$12 sps:$4 sm:$0xff]   ;;  %v1413_v52 = vld [vmem:[#allocation5 + $0xa8] ss:$12 sps:$4 sm:$0xff]  }
  0x38   :  { %1203 = vmatmul.mubr.msk.bf16.vlgmr.msra.gmra.mrb[4].mxu0 %vm351_vm3, %v332_v23  ;;  %1000 = vmatpush1.bf16.msra.mxu1 %v1374_v25  ;;  %v1416_v53 = vld [vmem:[#allocation5 + $0x228] ss:$12 sps:$4 sm:$0xff]   ;;  %v1421_v54 = vld [vmem:[#allocation5 + $0xc4] ss:$12 sps:$4 sm:$0xff]   ;;  %v1419_v56 = vld [vmem:[#allocation5 + $0xc0] ss:$12 sps:$4 sm:$0xff]  }
  0x39   :  { %959 = vmatpush1.bf16.msra.mxu0 %v1371_v24  ;;  %1001 = vmatprep.subr.bf16.mxu1 %v1382_v27  ;;  %v1424_v55 = vld [vmem:[#allocation5 + $0x244] ss:$12 sps:$4 sm:$0xff]   ;;  %v1422_v57 = vld [vmem:[#allocation5 + $0x240] ss:$12 sps:$4 sm:$0xff]   ;;  %v1427_v58 = vld [vmem:[#allocation5 + $0xdc] ss:$12 sps:$4 sm:$0xff]  }
  0x3a   :  { %960 = vmatprep.subr.bf16.mxu0 %v1379_v26  ;;  %v1430_v59 = vld [vmem:[#allocation5 + $0x25c] ss:$12 sps:$4 sm:$0xff]   ;;  %v1425_v60 = vld [vmem:[#allocation5 + $0xd8] ss:$12 sps:$4 sm:$0xff]   ;;  %v1433_v62 = vld [vmem:[#allocation5 + $0xf4] ss:$12 sps:$4 sm:$0xff]  }
  0x3b   :  { %v1428_v61 = vld [vmem:[#allocation5 + $0x258] ss:$12 sps:$4 sm:$0xff]   ;;  %v1436_v63 = vld [vmem:[#allocation5 + $0x274] ss:$12 sps:$4 sm:$0xff]   ;;  %v1431_v0 = vld [vmem:[#allocation5 + $0xf0] ss:$12 sps:$4 sm:$0xff]  }
  0x3c   :  { %1002 = vmatpush1.bf16.msra.mxu1 %v1380_v29  ;;  %v1434_v1 = vld [vmem:[#allocation5 + $0x270] ss:$12 sps:$4 sm:$0xff]   ;;  %v1439_v2 = vld [vmem:[#allocation5 + $0x10c] ss:$12 sps:$4 sm:$0xff]   ;;  %v1437_v4 = vld [vmem:[#allocation5 + $0x108] ss:$12 sps:$4 sm:$0xff]  }
  0x3d   :  { %961 = vmatpush1.bf16.msra.mxu0 %v1377_v28  ;;  %1003 = vmatprep.subr.bf16.mxu1 %v1388_v31  ;;  %v1442_v3 = vld [vmem:[#allocation5 + $0x28c] ss:$12 sps:$4 sm:$0xff]   ;;  %v1440_v6 = vld [vmem:[#allocation5 + $0x288] ss:$12 sps:$4 sm:$0xff]   ;;  %v1445_v7 = vld [vmem:[#allocation5 + $0x124] ss:$12 sps:$4 sm:$0xff]  }
  0x3e   :  { %962 = vmatprep.subr.bf16.mxu0 %v1385_v30  ;;  %v1448_v8 = vld [vmem:[#allocation5 + $0x2a4] ss:$12 sps:$4 sm:$0xff]   ;;  %v1443_v9 = vld [vmem:[#allocation5 + $0x120] ss:$12 sps:$4 sm:$0xff]   ;;  %v1451_v11 = vld [vmem:[#allocation5 + $0x13c] ss:$12 sps:$4 sm:$0xff]  }
  0x3f   :  { %v1446_v10 = vld [vmem:[#allocation5 + $0x2a0] ss:$12 sps:$4 sm:$0xff]   ;;  %v1454_v12 = vld [vmem:[#allocation5 + $0x2bc] ss:$12 sps:$4 sm:$0xff]   ;;  %v1449_v13 = vld [vmem:[#allocation5 + $0x138] ss:$12 sps:$4 sm:$0xff]  }
  0x40   :  { %1004 = vmatpush1.bf16.msra.mxu1 %v1386_v33  ;;  %v1452_v14 = vld [vmem:[#allocation5 + $0x2b8] ss:$12 sps:$4 sm:$0xff]   ;;  %v1457_v15 = vld [vmem:[#allocation5 + $0x154] ss:$12 sps:$4 sm:$0xff]   ;;  %v1455_v17 = vld [vmem:[#allocation5 + $0x150] ss:$12 sps:$4 sm:$0xff]  }
  0x41   :  { %963 = vmatpush1.bf16.msra.mxu0 %v1383_v32  ;;  %1005 = vmatprep.subr.bf16.mxu1 %v1394_v35  ;;  %v1460_v16 = vld [vmem:[#allocation5 + $0x2d4] ss:$12 sps:$4 sm:$0xff]   ;;  %v1458_v18 = vld [vmem:[#allocation5 + $0x2d0] ss:$12 sps:$4 sm:$0xff]   ;;  %v1463_v19 = vld [vmem:[#allocation5 + $0x16c] ss:$12 sps:$4 sm:$0xff]  }
  0x42   :  { %964 = vmatprep.subr.bf16.mxu0 %v1391_v34  ;;  %v1466_v20 = vld [vmem:[#allocation5 + $0x2ec] ss:$12 sps:$4 sm:$0xff]   ;;  %v1461_v21 = vld [vmem:[#allocation5 + $0x168] ss:$12 sps:$4 sm:$0xff]   ;;  %v1650_v25 = vsub.s32 0, %v1634_v5  ;;  %v1653_v26 = vsub.s32 2, %v1634_v5 }
  0x43   :  { %v1464_v22 = vld [vmem:[#allocation5 + $0x2e8] ss:$12 sps:$4 sm:$0xff]   ;;  %v68_v27 = vld [vmem:[%s1703_s3] sm:$0xf]  ;;  %v76_v28 = vsub.s32 1, %v1634_v5  ;;  %v84_v29 = vsub.s32 3, %v1634_v5 }
  0x44   :  { %1006 = vmatpush1.bf16.msra.mxu1 %v1392_v37  ;;  %v1467_v23 = vld [vmem:[#allocation5 + $0xc8] ss:$12 sps:$4 sm:$0xff]   ;;  %v73_v30 = vrot.slane %v68_v27, %v1650_v25  ;;  %v81_v31 = vrot.slane %v68_v27, %v1653_v26 }
  0x45   :  { %965 = vmatpush1.bf16.msra.mxu0 %v1389_v36  ;;  %1007 = vmatprep.subr.bf16.mxu1 %v1400_v39  ;;  %v1468_v24 = vld [vmem:[#allocation5 + $0x248] ss:$12 sps:$4 sm:$0xff]   ;;  %v77_v32 = vrot.slane %v68_v27, %v76_v28  ;;  %v85_v33 = vrot.slane %v68_v27, %v84_v29  ;;  %v1495_v27 = vld [vmem:[#allocation5 + $0x170] ss:$12 sps:$4 sm:$0xff]  }
  0x46   :  { %966 = vmatprep.subr.bf16.mxu0 %v1397_v38  ;;  %v1496_v29 = vld [vmem:[#allocation5 + $0x2f0] ss:$12 sps:$4 sm:$0xff]  }
  0x48   :  { %1008 = vmatpush1.bf16.msra.mxu1 %v1398_v41 }
  0x49   :  { %967 = vmatpush1.bf16.msra.mxu0 %v1395_v40  ;;  %1009 = vmatprep.subr.bf16.mxu1 %v1406_v43 }
  0x4a   :  { %968 = vmatprep.subr.bf16.mxu0 %v1403_v42 }
  0x4c   :  { %1010 = vmatpush1.bf16.msra.mxu1 %v1404_v45 }
  0x4d   :  { %969 = vmatpush1.bf16.msra.mxu0 %v1401_v44  ;;  %1011 = vmatprep.subr.bf16.mxu1 %v1412_v47 }
  0x4e   :  { %970 = vmatprep.subr.bf16.mxu0 %v1409_v46 }
  0x50   :  { %1012 = vmatpush1.bf16.msra.mxu1 %v1410_v49 }
  0x51   :  { %971 = vmatpush1.bf16.msra.mxu0 %v1407_v48  ;;  %1013 = vmatprep.subr.bf16.mxu1 %v1418_v51 }
  0x52   :  { %972 = vmatprep.subr.bf16.mxu0 %v1415_v50 }
  0x54   :  { %1014 = vmatpush1.bf16.msra.mxu1 %v1416_v53  ;;  %v1469_v53 = vld [vmem:[#allocation5 + $0x8] ss:$12 sps:$4 sm:$0xff]  }
  0x55   :  { %973 = vmatpush1.bf16.msra.mxu0 %v1413_v52  ;;  %1015 = vmatprep.subr.bf16.mxu1 %v1424_v55 }
  0x56   :  { %974 = vmatprep.subr.bf16.mxu0 %v1421_v54  ;;  %v1470_v54 = vld [vmem:[#allocation5 + $0x188] ss:$12 sps:$4 sm:$0xff]  }
  0x58   :  { %1016 = vmatpush1.bf16.msra.mxu1 %v1422_v57  ;;  %v1472_v57 = vld [vmem:[#allocation5 + $0x260] ss:$12 sps:$4 sm:$0xff]  }
  0x59   :  { %975 = vmatpush1.bf16.msra.mxu0 %v1419_v56  ;;  %1017 = vmatprep.subr.bf16.mxu1 %v1430_v59  ;;  %v1471_v56 = vld [vmem:[#allocation5 + $0xe0] ss:$12 sps:$4 sm:$0xff]  }
  0x5a   :  { %976 = vmatprep.subr.bf16.mxu0 %v1427_v58 }
  0x5c   :  { %1018 = vmatpush1.bf16.msra.mxu1 %v1428_v61 }
  0x5d   :  { %977 = vmatpush1.bf16.msra.mxu0 %v1425_v60  ;;  %1019 = vmatprep.subr.bf16.mxu1 %v1436_v63  ;;  %v1474_v63 = vld [vmem:[#allocation5 + $0x1a0] ss:$12 sps:$4 sm:$0xff]  }
  0x5e   :  { %978 = vmatprep.subr.bf16.mxu0 %v1433_v62  ;;  %v1473_v62 = vld [vmem:[#allocation5 + $0x20] ss:$12 sps:$4 sm:$0xff]  }
  0x60   :  { %1020 = vmatpush1.bf16.msra.mxu1 %v1434_v1 }
  0x61   :  { %979 = vmatpush1.bf16.msra.mxu0 %v1431_v0  ;;  %1021 = vmatprep.subr.bf16.mxu1 %v1442_v3  ;;  %v1476_v3 = vld [vmem:[#allocation5 + $0x278] ss:$12 sps:$4 sm:$0xff]  }
  0x62   :  { %980 = vmatprep.subr.bf16.mxu0 %v1439_v2  ;;  %v1475_v2 = vld [vmem:[#allocation5 + $0xf8] ss:$12 sps:$4 sm:$0xff]  }
  0x64   :  { %1022 = vmatpush1.bf16.msra.mxu1 %v1440_v6 }
  0x65   :  { %981 = vmatpush1.bf16.msra.mxu0 %v1437_v4  ;;  %1023 = vmatprep.subr.bf16.mxu1 %v1448_v8  ;;  %v1478_v8 = vld [vmem:[#allocation5 + $0x1b8] ss:$12 sps:$4 sm:$0xff]  }
  0x66   :  { %982 = vmatprep.subr.bf16.mxu0 %v1445_v7  ;;  %v1477_v7 = vld [vmem:[#allocation5 + $0x38] ss:$12 sps:$4 sm:$0xff]  }
  0x68   :  { %1024 = vmatpush1.bf16.msra.mxu1 %v1446_v10  ;;  %v1480_v10 = vld [vmem:[#allocation5 + $0x290] ss:$12 sps:$4 sm:$0xff]  }
  0x69   :  { %983 = vmatpush1.bf16.msra.mxu0 %v1443_v9  ;;  %1025 = vmatprep.subr.bf16.mxu1 %v1454_v12  ;;  %v1479_v9 = vld [vmem:[#allocation5 + $0x110] ss:$12 sps:$4 sm:$0xff]  }
  0x6a   :  { %984 = vmatprep.subr.bf16.mxu0 %v1451_v11  ;;  %v1481_v11 = vld [vmem:[#allocation5 + $0x50] ss:$12 sps:$4 sm:$0xff]  }
  0x6b   :  { %v1482_v12 = vld [vmem:[#allocation5 + $0x1d0] ss:$12 sps:$4 sm:$0xff]  }
  0x6c   :  { %1026 = vmatpush1.bf16.msra.mxu1 %v1452_v14  ;;  %v1484_v14 = vld [vmem:[#allocation5 + $0x2a8] ss:$12 sps:$4 sm:$0xff]  }
  0x6d   :  { %985 = vmatpush1.bf16.msra.mxu0 %v1449_v13  ;;  %1027 = vmatprep.subr.bf16.mxu1 %v1460_v16  ;;  %v1483_v13 = vld [vmem:[#allocation5 + $0x128] ss:$12 sps:$4 sm:$0xff]  }
  0x6e   :  { %986 = vmatprep.subr.bf16.mxu0 %v1457_v15  ;;  %v1485_v15 = vld [vmem:[#allocation5 + $0x68] ss:$12 sps:$4 sm:$0xff]  }
  0x6f   :  { %v1486_v16 = vld [vmem:[#allocation5 + $0x1e8] ss:$12 sps:$4 sm:$0xff]  }
  0x70   :  { %1028 = vmatpush1.bf16.msra.mxu1 %v1458_v18  ;;  %v1488_v18 = vld [vmem:[#allocation5 + $0x2c0] ss:$12 sps:$4 sm:$0xff]  }
  0x71   :  { %987 = vmatpush1.bf16.msra.mxu0 %v1455_v17  ;;  %1029 = vmatprep.subr.bf16.mxu1 %v1466_v20  ;;  %v1487_v17 = vld [vmem:[#allocation5 + $0x140] ss:$12 sps:$4 sm:$0xff]  }
  0x72   :  { %988 = vmatprep.subr.bf16.mxu0 %v1463_v19  ;;  %v1489_v19 = vld [vmem:[#allocation5 + $0x80] ss:$12 sps:$4 sm:$0xff]  }
  0x73   :  { %v1490_v20 = vld [vmem:[#allocation5 + $0x200] ss:$12 sps:$4 sm:$0xff]  }
  0x74   :  { %1030 = vmatpush1.bf16.msra.mxu1 %v1464_v22  ;;  %v1492_v22 = vld [vmem:[#allocation5 + $0x2d8] ss:$12 sps:$4 sm:$0xff]  }
  0x75   :  { %989 = vmatpush1.bf16.msra.mxu0 %v1461_v21  ;;  %1326 = vmatprep.subr.bf16.mxu1 %v1468_v24  ;;  %v1491_v21 = vld [vmem:[#allocation5 + $0x158] ss:$12 sps:$4 sm:$0xff]  }
  0x76   :  { %1304 = vmatprep.subr.bf16.mxu0 %v1467_v23  ;;  %v1493_v23 = vld [vmem:[#allocation5 + $0x98] ss:$12 sps:$4 sm:$0xff]  }
  0x77   :  { %v1494_v24 = vld [vmem:[#allocation5 + $0x218] ss:$12 sps:$4 sm:$0xff]  }
 0x102   :  { %v148_v34 = vpop.f32.mrb[0].mxu0  ;;  %v189_v35 = vpop.f32.mrb[0].mxu1 }
 0x103   :  { %v149_v36 = vadd.f32 %v148_v34, %v73_v30  ;;  %v190_v37 = vadd.f32 %v189_v35, %v81_v31  ;;  %v150_v38 = vpop.f32.mrb[1].mxu0  ;;  %v191_v39 = vpop.f32.mrb[1].mxu1  ;;  %v1497_v30 = vld [vmem:[#allocation5 + $0xb0] ss:$12 sps:$4 sm:$0xff]  }
 0x104   :  { %v151_v40 = vadd.f32 %v150_v38, %v77_v32  ;;  %v192_v41 = vadd.f32 %v191_v39, %v85_v33  ;;  %v152_v42 = vpop.f32.mrb[2].mxu0  ;;  %v193_v43 = vpop.f32.mrb[2].mxu1  ;;  %v1498_v31 = vld [vmem:[#allocation5 + $0x230] ss:$12 sps:$4 sm:$0xff]  }
 0x105   :  { %v196_v44 = vmax.f32 %v149_v36, 0.0  ;;  %v198_v45 = vmax.f32 %v190_v37, 0.0  ;;  %v153_v46 = vpop.f32.mrb[3].mxu0  ;;  %v194_v47 = vpop.f32.mrb[3].mxu1  ;;  %v1143_v32 = vld [vmem:[%s1707_s7] sm:$0x7] }
 0x106   :  { %v197_v48 = vmax.f32 %v151_v40, 0.0  ;;  %v199_v49 = vmax.f32 %v192_v41, 0.0  ;;  %v1144_v33 = vunpack.c.l.bf16 %v1143_v32  ;;  %v1120_v34 = vld [vmem:[%s1706_s6] sm:$0x7] }
 0x107   :  { %v1664_v50 = vpack.c.bf16 %v198_v45, %v198_v45  ;;  %v1666_v55 = vpack.c.bf16 %v196_v44, %v196_v44  ;;  %v1125_v38 = vrot.slane %v1120_v34, %v1650_v25  ;;  %v1129_v43 = vrot.slane %v1120_v34, %v76_v28 }
 0x108   :  { %v201_v51 = vpack.c.bf16 %v197_v48, %v197_v48  ;;  %v203_v52 = vpack.c.bf16 %v199_v49, %v199_v49  ;;  %v1149_v41 = vrot.slane %v1144_v33, %v1650_v25  ;;  %v1153_v46 = vrot.slane %v1144_v33, %v1653_v26 }
 0x10a   :  { %990 = vmatprep.mubr.bf16.mxu0 %v201_v51  ;;  %1031 = vmatprep.mubr.bf16.mxu1 %v203_v52  ;;  %v1670_v59 = vpop.f32.mrb[4].mxu1 }
 0x10b   :  { %v1668_v58 = vpop.f32.mrb[4].mxu0  ;;  %991 = vmatmul.mubr.bf16.vlgmr.msra.gmra.mrb[8].mxu0 %v1666_v55  ;;  %1032 = vmatmul.mubr.bf16.vlgmr.msra.gmra.mrb[8].mxu1 %v1664_v50  ;;  %v1352_v61 = vpop.f32.mrb[5].mxu1 }
 0x10c   :  { %v1674_v60 = vpop.f32.mrb[5].mxu0  ;;  %1305 = vmatpush3.bf16.msra.mxu0 %v1469_v53  ;;  %1327 = vmatpush3.bf16.msra.mxu1 %v1470_v54  ;;  %v443_v1 = vpop.f32.mrb[6].mxu1  ;;  %v1168_v54 = vrot.slane %v1153_v46, %v1650_v25 }
 0x10d   :  { %v403_v0 = vpop.f32.mrb[6].mxu0  ;;  %1072 = vmatprep.mubr.bf16.mxu0 %v201_v51  ;;  %1112 = vmatprep.mubr.bf16.mxu1 %v203_v52  ;;  %v1353_v6 = vpop.f32.mrb[7].mxu1  ;;  %v1164_v52 = vrot.slane %v1149_v41, %v1650_v25 }
 0x10e   :  { %v404_v4 = vpop.f32.mrb[7].mxu0  ;;  %1306 = vmatprep.subr.bf16.mxu0 %v1471_v56  ;;  %1328 = vmatprep.subr.bf16.mxu1 %v1472_v57 }
 0x110   :  { %1307 = vmatpush3.bf16.msra.mxu0 %v1473_v62  ;;  %1329 = vmatpush3.bf16.msra.mxu1 %v1474_v63  ;;  %v1156_v62 = vsub.s32 4, %v1634_v5 }
 0x111   :  { %1308 = vmatprep.subr.bf16.mxu0 %v1475_v2  ;;  %1330 = vmatprep.subr.bf16.mxu1 %v1476_v3 }
 0x114   :  { %1309 = vmatpush3.bf16.msra.mxu0 %v1477_v7  ;;  %1331 = vmatpush3.bf16.msra.mxu1 %v1478_v8 }
 0x115   :  { %1310 = vmatprep.subr.bf16.mxu0 %v1479_v9  ;;  %1332 = vmatprep.subr.bf16.mxu1 %v1480_v10  ;;  %v1133_v9 = vrot.slane %v1120_v34, %v1653_v26  ;;  %v1157_v10 = vrot.slane %v1144_v33, %v1156_v62 }
 0x118   :  { %1311 = vmatpush3.bf16.msra.mxu0 %v1481_v11  ;;  %1333 = vmatpush3.bf16.msra.mxu1 %v1482_v12 }
 0x119   :  { %1312 = vmatprep.subr.bf16.mxu0 %v1483_v13  ;;  %1334 = vmatprep.subr.bf16.mxu1 %v1484_v14  ;;  %v1172_v13 = vrot.slane %v1157_v10, %v1650_v25 }
 0x11c   :  { %1313 = vmatpush3.bf16.msra.mxu0 %v1485_v15  ;;  %1335 = vmatpush3.bf16.msra.mxu1 %v1486_v16  ;;  %v1301_v16 = vld [vmem:[#allocation2] ss:$0 sm:$0xff] }
 0x11d   :  { %1314 = vmatprep.subr.bf16.mxu0 %v1487_v17  ;;  %1336 = vmatprep.subr.bf16.mxu1 %v1488_v18 }
 0x120   :  { %1315 = vmatpush3.bf16.msra.mxu0 %v1489_v19  ;;  %1337 = vmatpush3.bf16.msra.mxu1 %v1490_v20 }
 0x121   :  { %1316 = vmatprep.subr.bf16.mxu0 %v1491_v21  ;;  %1338 = vmatprep.subr.bf16.mxu1 %v1492_v22 }
 0x124   :  { %1317 = vmatpush3.bf16.msra.mxu0 %v1493_v23  ;;  %1339 = vmatpush3.bf16.msra.mxu1 %v1494_v24 }
 0x125   :  { %1318 = vmatprep.subr.bf16.mxu0 %v1495_v27  ;;  %1340 = vmatprep.subr.bf16.mxu1 %v1496_v29 }
 0x128   :  { %1319 = vmatpush3.bf16.msra.mxu0 %v1497_v30  ;;  %1341 = vmatpush3.bf16.msra.mxu1 %v1498_v31 }
 0x12b   :  { %1073 = vmatmul.mubr.bf16.vlgmr.msra.gmra.mrb[12].mxu0 %v1666_v55  ;;  %1113 = vmatmul.mubr.bf16.vlgmr.msra.gmra.mrb[12].mxu1 %v1664_v50 }
 0x1de   :  { %v992_v35 = vpop.f32.mrb[8].mxu0  ;;  %v1033_v36 = vpop.f32.mrb[8].mxu1 }
 0x1df   :  { %v993_v37 = vadd.f32 %v992_v35, %v1668_v58  ;;  %v994_v39 = vpop.f32.mrb[9].mxu0  ;;  %v1035_v40 = vpop.f32.mrb[9].mxu1 }
 0x1e0   :  { %v995_v42 = vadd.f32 %v994_v39, %v1674_v60  ;;  %v996_v44 = vpop.f32.mrb[10].mxu0  ;;  %v1037_v45 = vpop.f32.mrb[10].mxu1 }
 0x1e1   :  { %v1034_v47 = vadd.f32 %v1033_v36, %v993_v37  ;;  %v997_v48 = vpop.f32.mrb[11].mxu0  ;;  %v1038_v49 = vpop.f32.mrb[11].mxu1 }
 0x1e2   :  { %v1036_v50 = vadd.f32 %v1035_v40, %v995_v42 }
 0x1e3   :  { %v1137_v51 = vadd.f32 %v1125_v38, %v1034_v47 }
 0x1e4   :  { %v1138_v53 = vadd.f32 %v1129_v43, %v1036_v50 }
 0x1e5   :  { %v1140_v55 = vmax.f32 %v1137_v51, 0.0 }
 0x1e6   :  { %v1141_v56 = vmax.f32 %v1138_v53, 0.0 }
 0x1e7   :  { %v1173_v57 = vmul.f32 %v1164_v52, %v1140_v55 }
 0x1e8   :  { %v1174_v58 = vmul.f32 %v1168_v54, %v1141_v56 }
 0x1ea   :  { %v1176_v60 = vadd.f32 %v1174_v58, %v1173_v57 }
 0x1fe   :  { %v1320_v28 = vpop.f32.mrb[12].mxu0  ;;  %v1342_v61 = vpop.f32.mrb[12].mxu1 }
 0x1ff   :  { %v1321_v63 = vpop.f32.mrb[13].mxu0  ;;  %v1343_v0 = vpop.f32.mrb[13].mxu1 }
 0x200   :  { %v1322_v1 = vadd.f32 %v1321_v63, %v1320_v28  ;;  %v1344_v2 = vadd.f32 %v1343_v0, %v1342_v61  ;;  %v1323_v3 = vpop.f32.mrb[14].mxu0  ;;  %v1345_v4 = vpop.f32.mrb[14].mxu1 }
 0x201   :  { %v1324_v6 = vpop.f32.mrb[15].mxu0  ;;  %v1346_v7 = vpop.f32.mrb[15].mxu1 }
 0x202   :  { %v1075_v8 = vadd.f32 %v1322_v1, %v1670_v59 }
 0x204   :  { %v1115_v11 = vadd.f32 %v1344_v2, %v1075_v8 }
 0x206   :  { %v1139_v12 = vadd.f32 %v1133_v9, %v1115_v11 }
 0x208   :  { %v1142_v14 = vmax.f32 %v1139_v12, 0.0 }
 0x20a   :  { %v1175_v15 = vmul.f32 %v1172_v13, %v1142_v14 }
 0x20c   :  { %v1177_v5 = vadd.f32 %v1176_v60, %v1175_v15 }
 0x20e   :  { %1178 = vadd.xlane.f32.xlu0 %v1177_v5 }
 0x29b   :  { %v1179_v17 = vpop.xlane.xlu0 %1178 }
 0x29c   :  { %v1187_v18 = vadd.f32 %v1301_v16, %v1179_v17 }
 0x29e   :  { %1189 = vst.msk [vmem:[%s1709_s9] sm:$0xff] %vm1188_vm4, %v1187_v18 }
 0x29f   :  { %1194 = vsyncpa [#allocation4], 1 }
 0x2a0   :  { %1195 = vsyncpa [#allocation6], 1 }

</bundles_post_ra>
